<compile_context>
chip_gen: v5e
topology: v5e:2x2
jax: 0.10.0
libtpu: 0.0.40
codegen_flags: <defaults>
</compile_context>

<pallas_src>
import jax
import jax.numpy as jnp
from jax.experimental import pallas as pl
from jax.experimental.pallas import tpu as pltpu


def _round_up(x, m):
    return (x + m - 1) // m * m


def _policy_kernel(x_ref, w1_ref, b1_ref, w2_ref, b2_ref, o_ref):
    # x_ref:  (TB, D)   bf16  flattened (batch-padded) input tile
    # w1_ref: (D, H)    bf16  first linear weight (pre-transposed)
    # b1_ref: (1, H)    f32
    # w2_ref: (H, Ap)   bf16  second linear weight, lane-padded to Ap (mult of 128)
    # b2_ref: (1, Ap)   f32
    # o_ref:  (TB, Ap)  f32   lane-dense output slab (unmasked stores)
    x = x_ref[...]
    h = jnp.dot(x, w1_ref[...], preferred_element_type=jnp.float32)
    h = jnp.maximum(h + b1_ref[...], 0.0)                       # bias + ReLU in f32
    out = jnp.dot(h.astype(jnp.bfloat16), w2_ref[...],
                  preferred_element_type=jnp.float32) + b2_ref[...]
    o_ref[...] = out.astype(o_ref.dtype)


def policy_net_forward(z, w1, b1, w2, b2, *, block_b=128):
    """relu(flatten(z) @ w1 + b1) @ w2 + b2  (same math as PolicyNet.forward).

    z:  (B, num_patches, embed_dim) f32
    w1: (D, H) f32 with D = embed_dim * num_patches (pre-transposed vs torch)
    b1: (H,) f32
    w2: (H, A) f32 (pre-transposed vs torch)
    b2: (A,) f32
    returns (B, A) f32
    """
    B = z.shape[0]
    D, H = w1.shape
    A = w2.shape[1]

    x = z.reshape(B, D)                      # nn.Flatten(start_dim=1), row-major

    # Lane-dense output: pad action dim to a multiple of 128.
    A_pad = _round_up(max(A, 128), 128)
    w2_p = jnp.zeros((H, A_pad), w2.dtype).at[:, :A].set(w2)
    b2_p = jnp.zeros((1, A_pad), b2.dtype).at[:, :A].set(b2.reshape(1, A))
    b1_2d = b1.reshape(1, H)

    # bf16 MXU operands (halves weight DMA bytes, 2-4x MXU rate); f32 accum.
    x_bf = x.astype(jnp.bfloat16)
    w1_bf = w1.astype(jnp.bfloat16)
    w2_bf = w2_p.astype(jnp.bfloat16)

    cost = pl.CostEstimate(
        flops=2 * B * D * H + 2 * B * H * A_pad,
        transcendentals=0,
        bytes_accessed=(x_bf.size * 2 + w1_bf.size * 2 + w2_bf.size * 2
                        + b1_2d.size * 4 + b2_p.size * 4 + B * A_pad * 4),
    )

    if B <= block_b:
        # Small batch: single full-array block in VMEM, no grid at all.
        B_pad = _round_up(max(B, 8), 8)                 # sublane multiple
        x_p = jnp.zeros((B_pad, D), x_bf.dtype).at[:B, :].set(x_bf)
        vmem = pl.BlockSpec(memory_space=pltpu.MemorySpace.VMEM)
        out = pl.pallas_call(
            _policy_kernel,
            out_shape=jax.ShapeDtypeStruct((B_pad, A_pad), jnp.float32),
            in_specs=[vmem, vmem, vmem, vmem, vmem],
            out_specs=vmem,
            cost_estimate=cost,
        )(x_p, w1_bf, b1_2d, w2_bf, b2_p)
    else:
        # Large batch: tile the batch axis; weights stay resident (constant
        # block index), batch axis sharded across TensorCores on v7x.
        B_pad = _round_up(B, block_b)
        x_p = jnp.zeros((B_pad, D), x_bf.dtype).at[:B, :].set(x_bf)
        out = pl.pallas_call(
            _policy_kernel,
            out_shape=jax.ShapeDtypeStruct((B_pad, A_pad), jnp.float32),
            grid=(B_pad // block_b,),
            in_specs=[
                pl.BlockSpec((block_b, D), lambda i: (i, 0)),
                pl.BlockSpec((D, H), lambda i: (0, 0)),
                pl.BlockSpec((1, H), lambda i: (0, 0)),
                pl.BlockSpec((H, A_pad), lambda i: (0, 0)),
                pl.BlockSpec((1, A_pad), lambda i: (0, 0)),
            ],
            out_specs=pl.BlockSpec((block_b, A_pad), lambda i: (i, 0)),
            compiler_params=pltpu.CompilerParams(
                dimension_semantics=("parallel",)),
            cost_estimate=cost,
        )(x_p, w1_bf, b1_2d, w2_bf, b2_p)

    # TODO(synk): if D/H ever grow to tens of thousands, add a K-tiling grid
    # axis over D with an f32 VMEM accumulator (pl.when init/finalize) instead
    # of single full-operand blocks, to stay under v7x's 64 MiB VMEM.
    return out[:B, :A]


if __name__ == "__main__":
    # Shapes consistent with PolicyNet(embed_dim=32, num_patches=8, action_dim=8).
    embed_dim = 32
    num_patches = 8
    hidden_dim = 128
    action_dim = 8
    D = embed_dim * num_patches

    key = jax.random.PRNGKey(0)
    kz, kw1, kb1, kw2, kb2, kz2 = jax.random.split(key, 6)

    # Parameters stored pre-transposed as (in_features, out_features).
    w1 = jax.random.normal(kw1, (D, hidden_dim), jnp.float32) * 0.02
    b1 = jax.random.normal(kb1, (hidden_dim,), jnp.float32) * 0.02
    w2 = jax.random.normal(kw2, (hidden_dim, action_dim), jnp.float32) * 0.02
    b2 = jax.random.normal(kb2, (action_dim,), jnp.float32) * 0.02

    def reference(zz):
        xx = zz.reshape(zz.shape[0], D)
        hh = jnp.maximum(
            jnp.dot(xx, w1, precision=jax.lax.Precision.HIGHEST) + b1, 0.0)
        return jnp.dot(hh, w2, precision=jax.lax.Precision.HIGHEST) + b2

    # 1) Small batch -> single-block, no-grid path.
    z_small = jax.random.normal(kz, (2, num_patches, embed_dim), jnp.float32)
    out_small = policy_net_forward(z_small, w1, b1, w2, b2)
    jax.block_until_ready(out_small)
    assert out_small.shape == (2, action_dim)
    assert jnp.allclose(out_small, reference(z_small), atol=5e-3, rtol=5e-2)

    # 2) Larger batch -> batch-tiled, megacore-parallel path.
    z_big = jax.random.normal(kz2, (256, num_patches, embed_dim), jnp.float32)
    out_big = policy_net_forward(z_big, w1, b1, w2, b2)
    jax.block_until_ready(out_big)
    assert out_big.shape == (256, action_dim)
    assert jnp.allclose(out_big, reference(z_big), atol=5e-3, rtol=5e-2)

    print("KERNEL_OK")
</pallas_src>

<mosaic_0001>
module attributes {stable_mosaic.version = 11 : i64} {
  func.func @_policy_kernel(%arg0: memref<8x256xbf16, #tpu.memory_space<vmem>>, %arg1: memref<256x128xbf16, #tpu.memory_space<vmem>>, %arg2: memref<1x128xf32, #tpu.memory_space<vmem>>, %arg3: memref<128x128xbf16, #tpu.memory_space<vmem>>, %arg4: memref<1x128xf32, #tpu.memory_space<vmem>>, %arg5: memref<8x128xf32, #tpu.memory_space<vmem>>) attributes {dimension_semantics = [], scalar_prefetch = 0 : i64, scratch_operands = 0 : i64, tpu.core_type = #tpu.core_type<tc>} {
    %c0 = arith.constant 0 : index
    %c0_0 = arith.constant 0 : index
    %0 = vector.load %arg0[%c0, %c0_0] : memref<8x256xbf16, #tpu.memory_space<vmem>>, vector<8x256xbf16>
    %c0_1 = arith.constant 0 : index
    %c0_2 = arith.constant 0 : index
    %1 = vector.load %arg1[%c0_1, %c0_2] : memref<256x128xbf16, #tpu.memory_space<vmem>>, vector<256x128xbf16>
    %cst = arith.constant dense<0.000000e+00> : vector<8x128xf32>
    %2 = tpu.matmul %0, %1, %cst {dimension_numbers = #tpu.dot_dimension_numbers<[1], [0], [0], [1], [0, 0, 1, 1], [], []>} : vector<8x256xbf16>, vector<256x128xbf16>, vector<8x128xf32> -> vector<8x128xf32>
    %c0_3 = arith.constant 0 : index
    %c0_4 = arith.constant 0 : index
    %3 = vector.load %arg2[%c0_3, %c0_4] : memref<1x128xf32, #tpu.memory_space<vmem>>, vector<1x128xf32>
    %4 = vector.broadcast %3 : vector<1x128xf32> to vector<8x128xf32>
    %5 = arith.addf %2, %4 : vector<8x128xf32>
    %cst_5 = arith.constant 0.000000e+00 : f32
    %6 = vector.broadcast %cst_5 : f32 to vector<8x128xf32>
    %7 = arith.maximumf %5, %6 : vector<8x128xf32>
    %8 = arith.truncf %7 : vector<8x128xf32> to vector<8x128xbf16>
    %c0_6 = arith.constant 0 : index
    %c0_7 = arith.constant 0 : index
    %9 = vector.load %arg3[%c0_6, %c0_7] : memref<128x128xbf16, #tpu.memory_space<vmem>>, vector<128x128xbf16>
    %cst_8 = arith.constant dense<0.000000e+00> : vector<8x128xf32>
    %10 = tpu.matmul %8, %9, %cst_8 {dimension_numbers = #tpu.dot_dimension_numbers<[1], [0], [0], [1], [0, 0, 1, 1], [], []>} : vector<8x128xbf16>, vector<128x128xbf16>, vector<8x128xf32> -> vector<8x128xf32>
    %c0_9 = arith.constant 0 : index
    %c0_10 = arith.constant 0 : index
    %11 = vector.load %arg4[%c0_9, %c0_10] : memref<1x128xf32, #tpu.memory_space<vmem>>, vector<1x128xf32>
    %12 = vector.broadcast %11 : vector<1x128xf32> to vector<8x128xf32>
    %13 = arith.addf %10, %12 : vector<8x128xf32>
    %c0_11 = arith.constant 0 : index
    %c0_12 = arith.constant 0 : index
    %14 = vector.load %arg5[%c0_11, %c0_12] : memref<8x128xf32, #tpu.memory_space<vmem>>, vector<8x128xf32>
    tpu.vector_store %arg5[%c0_11, %c0_12], %13 {strides = array<i32>} : memref<8x128xf32, #tpu.memory_space<vmem>>, vector<8x128xf32>,
    return
  }
}

</mosaic_0001>

<bundles_post_ra>
// kernel: tpu_custom_call.1
= control target key start
LH: loop header
LB: loop body
LE: loop exit
PB: predicated region body
PF: predicated region fallthrough
CT: control target
= control target key end

     0   :  { %10 = vsyncpa [#allocation3], 0  ;;  %s618_s0 = inlined_call_operand.hbm [shape: bf16[8,256], index: 0, kind: input, shape index: {}]   ;;  %s619_s1 = inlined_call_operand.hbm [shape: bf16[256,128], index: 1, kind: input, shape index: {}]   ;;  %s620_s2 = inlined_call_operand.vmem [shape: f32[1,128], index: 2, kind: input, shape index: {}]   ;;  %s621_s3 = inlined_call_operand.hbm [shape: bf16[128,128], index: 3, kind: input, shape index: {}]   ;;  %s622_s4 = inlined_call_operand.vmem [shape: f32[1,128], index: 4, kind: input, shape index: {}]   ;;  %s623_s5 = inlined_call_operand.hbm [shape: f32[8,128], index: 5, kind: output, shape index: {}]  }
   0x1   :  { %11 = vsyncpa [#allocation6], 0  ;;  %s28_s20 = sshll.u32 %s619_s1, 4  ;;  %s29_s20 = int_to_ptr.hbm [resolvable:$true] %s28_s20 }
   0x2   :  { %12 = vsyncpa [#allocation4], 0  ;;  %s564_s21 = smov [#allocation5]   ;;  %s18_s25 = sshll.u32 %s618_s0, 4  ;;  %s19_s25 = int_to_ptr.hbm [resolvable:$true] %s18_s25 }
   0x3   :  { %s30_s22 = sshll.u32 %s564_s21, 4  ;;  %s565_s26 = smov 64   ;;  %s31_s22 = int_to_ptr.vmem [resolvable:$true] %s30_s22 }
   0x4   :  { %s566_s27 = smov 4   ;;  %s567_s28 = smov [#allocation2]  }
   0x5   :  { %36 = dma.hbm_to_vmem [thread:$0]  %s29_s20, 2048, %s31_s22, [#allocation6], %s565_s26, %s565_s26, %s566_s27  }
   0x6   :  { %s20_s29 = sshll.u32 %s567_s28, 4  ;;  %s43_s7 = sshll.u32 %s621_s3, 4  ;;  %s21_s29 = int_to_ptr.vmem [resolvable:$true] %s20_s29  ;;  %s44_s7 = int_to_ptr.hbm [resolvable:$true] %s43_s7 }
   0x7   :  { %23 = dma.hbm_to_vmem [thread:$0]  %s19_s25, 128, %s21_s29, [#allocation3]  }
   0x8   :  { %s568_s1 = smov [#allocation7]  }
   0x9   :  { %s45_s8 = sshll.u32 %s568_s1, 4  ;;  %s46_s8 = int_to_ptr.vmem [resolvable:$true] %s45_s8 }
   0xa   :  { %51 = dma.hbm_to_vmem [thread:$0]  %s44_s7, 1024, %s46_s8, [#allocation6], %s565_s26, %s565_s26, %s566_s27  }
   0xb   :  { %558 = dma.done.wait [#allocation3], 128  }
   0xc   :  { %559 = vsyncadd [#allocation3], 4294967168 }
   0xd   :  { %560 = dma.done.wait [#allocation6], 3072  }
   0xe   :  { %561 = vsyncadd [#allocation6], 4294964224  ;;  %v437_v0 = vld [vmem:[#allocation5 + $0x38] sm:$0xff]  ;;  %v436_v2 = vld [vmem:[#allocation5 + $0x30] sm:$0xff]  ;;  %s569_s11 = smov [#allocation8]   ;;  %s323_s15 = sshll.u32 %s623_s5, 4  ;;  %s324_s15 = int_to_ptr.hbm [resolvable:$true] %s323_s15 }
   0xf   :  { %v445_v1 = vld [vmem:[#allocation5 + $0x78] sm:$0xff]  ;;  %206 = vmatpush.bf16.msra.mxu0 %v437_v0  ;;  %v444_v3 = vld [vmem:[#allocation5 + $0x70] sm:$0xff]  ;;  %v435_v5 = vld [vmem:[#allocation5 + $0x28] sm:$0xff]  ;;  %s321_s12 = sshll.u32 %s569_s11, 4  ;;  %s322_s12 = int_to_ptr.vmem [resolvable:$true] %s321_s12 }
  0x10   :  { %219 = vmatpush.bf16.msra.mxu1 %v445_v1  ;;  %v453_v4 = vld [vmem:[#allocation7 + $0x38] sm:$0xff]  ;;  %v443_v6 = vld [vmem:[#allocation5 + $0x68] sm:$0xff]  ;;  %v452_v7 = vld [vmem:[#allocation7 + $0x30] sm:$0xff] }
  0x11   :  { %302 = vmatpush.bf16.msra.mxu2 %v453_v4  ;;  %v434_v8 = vld [vmem:[#allocation5 + $0x20] sm:$0xff]  ;;  %v451_v10 = vld [vmem:[#allocation7 + $0x28] sm:$0xff]  ;;  %v433_v11 = vld [vmem:[#allocation5 + $0x18] sm:$0xff] }
  0x12   :  { %v442_v9 = vld [vmem:[#allocation5 + $0x60] sm:$0xff]  ;;  %v441_v12 = vld [vmem:[#allocation5 + $0x58] sm:$0xff]  ;;  %v432_v14 = vld [vmem:[#allocation5 + $0x10] sm:$0xff] }
  0x13   :  { %207 = vmatpush.bf16.msra.mxu0 %v436_v2  ;;  %v450_v13 = vld [vmem:[#allocation7 + $0x20] sm:$0xff]  ;;  %v440_v15 = vld [vmem:[#allocation5 + $0x50] sm:$0xff]  ;;  %v449_v16 = vld [vmem:[#allocation7 + $0x18] sm:$0xff] }
  0x14   :  { %220 = vmatpush.bf16.msra.mxu1 %v444_v3  ;;  %v431_v17 = vld [vmem:[#allocation5 + $0x8] sm:$0xff]  ;;  %v66_v19 = vld [vmem:[#allocation2] sm:$0xff]  ;;  %v448_v20 = vld [vmem:[#allocation7 + $0x10] sm:$0xff] }
  0x15   :  { %303 = vmatpush.bf16.msra.mxu2 %v452_v7  ;;  %v439_v18 = vld [vmem:[#allocation5 + $0x48] sm:$0xff]  ;;  %v104_v21 = vunpack.c.l.b16 %v66_v19  ;;  %v105_v22 = vunpack.c.h.b16 %v66_v19  ;;  %v430_v23 = vld [vmem:[#allocation5] sm:$0xff]  ;;  %v460_v29 = vld [vmem:[%s620_s2] ss:$0 sm:$0xff] }
  0x16   :  { %v438_v24 = vld [vmem:[#allocation5 + $0x40] sm:$0xff]  ;;  %v447_v27 = vld [vmem:[#allocation7 + $0x8] sm:$0xff]  ;;  %v461_v38 = vld [vmem:[%s622_s4] ss:$0 sm:$0xff] }
  0x17   :  { %208 = vmatpush.bf16.msra.mxu0 %v435_v5  ;;  %v106_v25 = vpack.c.b16 %v104_v21, %v104_v21  ;;  %v107_v26 = vpack.c.b16 %v105_v22, %v105_v22  ;;  %v446_v28 = vld [vmem:[#allocation7] sm:$0xff] }
  0x18   :  { %221 = vmatpush.bf16.msra.mxu1 %v443_v6 }
  0x19   :  { %304 = vmatpush.bf16.msra.mxu2 %v451_v10 }
  0x1b   :  { %209 = vmatpush.bf16.msra.mxu0 %v434_v8 }
  0x1c   :  { %222 = vmatpush.bf16.msra.mxu1 %v442_v9 }
  0x1d   :  { %305 = vmatpush.bf16.msra.mxu2 %v450_v13 }
  0x1f   :  { %210 = vmatpush.bf16.msra.mxu0 %v433_v11 }
  0x20   :  { %223 = vmatpush.bf16.msra.mxu1 %v441_v12 }
  0x21   :  { %306 = vmatpush.bf16.msra.mxu2 %v449_v16 }
  0x23   :  { %211 = vmatpush.bf16.msra.mxu0 %v432_v14 }
  0x24   :  { %224 = vmatpush.bf16.msra.mxu1 %v440_v15 }
  0x25   :  { %307 = vmatpush.bf16.msra.mxu2 %v448_v20 }
  0x27   :  { %212 = vmatpush.bf16.msra.mxu0 %v431_v17 }
  0x28   :  { %225 = vmatpush.bf16.msra.mxu1 %v439_v18 }
  0x29   :  { %308 = vmatpush.bf16.msra.mxu2 %v447_v27 }
  0x2b   :  { %213 = vmatpush.bf16.msra.mxu0 %v430_v23 }
  0x2c   :  { %226 = vmatpush.bf16.msra.mxu1 %v438_v24 }
  0x2d   :  { %309 = vmatpush.bf16.msra.mxu2 %v446_v28 }
  0x2e   :  { %214 = vmatmul.bf16.vlgmr.msra.gmra.mxu0 %v106_v25 }
  0x2f   :  { %227 = vmatmul.bf16.vlgmr.msra.gmra.mxu1 %v107_v26 }
  0xab   :  { %v215_v30 = vpop.f32.mrf.mxu0 }
  0xac   :  { %v228_v31 = vpop.f32.mrf.mxu1  ;;  %v216_v32 = vadd.f32 %v460_v29, %v215_v30 }
  0xae   :  { %v229_v33 = vadd.f32 %v228_v31, %v216_v32 }
  0xb0   :  { %v232_v34 = vmax.f32 %v229_v33, 0.0 }
  0xb2   :  { %v233_v35 = vpack.c.bf16 %v232_v34, %v232_v34 }
  0xb3   :  { %v217_v36 = vpop.f32.mrf.mxu0 }
  0xb4   :  { %v230_v37 = vpop.f32.mrf.mxu1  ;;  %310 = vmatmul.bf16.vlgmr.msra.gmra.mxu2 %v233_v35 }
 0x137   :  { %v311_v39 = vpop.f32.mrf.mxu2 }
 0x138   :  { %v312_v40 = vadd.f32 %v461_v38, %v311_v39 }
 0x13a   :  { %315 = vst [vmem:[#allocation8] sm:$0xff] %v312_v40 }
 0x13b   :  { %326 = dma.vmem_to_hbm [thread:$0]  %s322_s12, 128, %s324_s15, [#allocation4]  }
 0x13f   :  { %v313_v41 = vpop.f32.mrf.mxu2 }
 0x140   :  { %562 = dma.done.wait [#allocation4], 128  }
 0x141   :  { %563 = vsyncadd [#allocation4], 4294967168 }
 0x142   :  { %331 = vsyncpa [#allocation3], 1 }
 0x143   :  { %332 = vsyncpa [#allocation6], 1 }
 0x144   :  { %333 = vsyncpa [#allocation4], 1 }

</bundles_post_ra>
